<compile_context>
chip_gen: v6e
topology: v6e:2x2x1
jax: 0.10.0
libtpu: 0.0.40
codegen_flags: <defaults>
</compile_context>

<pallas_src>
import functools

import jax
import jax.numpy as jnp
import numpy as np
from jax import lax
from jax.experimental import pallas as pl
from jax.experimental.pallas import tpu as pltpu


def _linear_attention_kernel(q_ref, k_ref, v_ref, phiq_ref, phik_ref,
                             out_ref, *rest, embed_dim, compute_attn_weight):
    if compute_attn_weight:
        attn_ref, s_scr, ksum_scr, kv_scr = rest
    else:
        attn_ref = None
        s_scr, ksum_scr, kv_scr = rest

    in_dtype = k_ref.dtype
    head_block = k_ref.shape[0]
    seq = k_ref.shape[1]                       # full sequence length
    inv_probe_scale = 1.0 / (float(seq) * float(embed_dim) ** 0.5)

    qi = pl.program_id(1)

    # ---- whole-sequence pass: once per head block (first q-tile only) ------
    @pl.when(qi == 0)
    def _():
        def kv_body(h, carry):
            Q = q_ref[h]          # [S, D]
            K = k_ref[h]          # [S, D]
            V = v_ref[h]          # [S, D]
            phiK = phik_ref[h]    # [S, Dp]

            # q_probe = mean_seq(Q) / sqrt(embed_dim)            -> [1, D]
            q_probe = jnp.sum(Q.astype(jnp.float32), axis=0,
                              keepdims=True) * inv_probe_scale

            # scores = softmax_seq(<K[s,:], q_probe>) kept in [S, 1] layout
            # (VPU broadcast-multiply + lane reduce; no 1xN MXU matmul).
            s = jnp.sum(K.astype(jnp.float32) * q_probe, axis=-1,
                        keepdims=True)
            s = jnp.exp(s - jnp.max(s, axis=0, keepdims=True))
            s = s * pl.reciprocal(jnp.sum(s, axis=0, keepdims=True),
                                  approx=True)

            phiK_s32 = phiK.astype(jnp.float32) * s                  # [S, Dp]
            K_sum = jnp.sum(phiK_s32, axis=0, keepdims=True) + 1e-6  # [1, Dp]

            # KV = phi_K_s^T @ V without materializing a transpose -> [Dp, D]
            KV = lax.dot_general(phiK_s32.astype(in_dtype), V,
                                 (((0,), (0,)), ((), ())),
                                 preferred_element_type=jnp.float32)

            s_scr[h] = s
            ksum_scr[h] = K_sum
            kv_scr[h] = KV          # kept in f32 (accuracy for bf16 inputs)
            return carry

        lax.fori_loop(0, head_block, kv_body, 0)

    # ---- per q-tile pass ----------------------------------------------------
    def q_body(h, carry):
        phiQ = phiq_ref[h]                                          # [Sq, Dp]
        phiQ32 = phiQ.astype(jnp.float32)

        # num = phiQ @ KV                                           -> [Sq, D]
        num = lax.dot_general(phiQ32, kv_scr[h], (((1,), (0,)), ((), ())),
                              preferred_element_type=jnp.float32)
        # den = phiQ @ K_sum^T is an Nx1 matmul -> VPU mul + lane reduce.
        den = jnp.sum(phiQ32 * ksum_scr[h], axis=-1, keepdims=True)  # [Sq, 1]
        out_ref[h] = (num * pl.reciprocal(den, approx=True)).astype(
            out_ref.dtype)

        if compute_attn_weight:
            # phiQ @ (phi_K * s)^T without a transpose (contract Dp).
            phiK_s = (phik_ref[h].astype(jnp.float32)
                      * s_scr[h]).astype(in_dtype)                   # [S, Dp]
            la = lax.dot_general(phiQ, phiK_s, (((1,), (1,)), ((), ())),
                                 preferred_element_type=jnp.float32)  # [Sq,S]
            # Exact row normalization (debug/inspection output).
            la = la / jnp.sum(la, axis=-1, keepdims=True)
            attn_ref[h] = la.astype(attn_ref.dtype)
        return carry

    lax.fori_loop(0, head_block, q_body, 0)


# --------------------------- tiling heuristics -------------------------------
def _vmem_budget_bytes():
    """Per-generation scoped-VMEM budget (leave headroom for Mosaic scratch)."""
    cap = 128 * 2**20
    try:
        cap = int(pltpu.get_tpu_info().vmem_capacity_bytes)
    except Exception:
        pass
    if cap <= 64 * 2**20:                       # v7x-class TC: 64 MiB physical
        return max(16 * 2**20, min(48 * 2**20, cap - 8 * 2**20))
    return max(32 * 2**20, min(100 * 2**20, cap - 16 * 2**20))   # v5e / v6e


def _pick_q_tile(S):
    if S <= 512:
        return S
    for cand in (512, 256, 128):
        if S % cand == 0:
            return cand
    return S   # TODO(synk): padded/ragged q-tiling for awkward sequence lengths


def _footprint_bytes(hb, S, Sq, D, Dp, itemsize, compute_attn_weight):
    """Rough per-grid-step VMEM footprint (double-buffered IO + scratch + temps)."""
    in_b = hb * (3 * S * D + S * Dp + Sq * Dp) * itemsize
    out_b = hb * Sq * D * itemsize
    if compute_attn_weight:
        out_b += hb * Sq * S * itemsize
    scratch = hb * (S + Dp + Dp * D) * 4
    # f32 temporaries for ONE head (fori_loop bounds live ranges).
    temps = (2 * S * Dp + S * D + Sq * Dp + 2 * Sq * D) * 4
    if compute_attn_weight:
        temps += 2 * Sq * S * 4
    return 2 * (in_b + out_b) + scratch + temps


def _pick_head_block(BH, S, Sq, D, Dp, itemsize, compute_attn_weight, budget):
    if compute_attn_weight:
        return 1                     # quadratic attn block: one head at a time
    def fits(hb):
        return _footprint_bytes(hb, S, Sq, D, Dp, itemsize,
                                False) <= 0.75 * budget
    cands = [hb for hb in (8, 4, 2, 1) if BH % hb == 0 and fits(hb)]
    if not cands:
        return 1
    for hb in cands:                 # prefer an even, >=2 step count (v7x megacore)
        steps = BH // hb
        if steps >= 2 and steps % 2 == 0:
            return hb
    return cands[0]


# ----------------------------- public wrapper --------------------------------
def linear_attention(Q, K, V, phi_Q, phi_K, *, embed_dim,
                     compute_attn_weight=False, head_block=None, q_tile=None):
    """Pallas implementation of LinearAttention.forward.

    Inputs:  Q, K, V      [B, H, S, D]
             phi_Q, phi_K [B, H, S, Dp]
    Returns: (out [B, H, S, D], attn [B, H, S, S] or None)
    """
    B, H, S, D = Q.shape
    Dp = phi_Q.shape[-1]
    BH = B * H
    itemsize = jnp.dtype(Q.dtype).itemsize

    budget = _vmem_budget_bytes()
    Sq = _pick_q_tile(S) if q_tile is None else int(q_tile)
    assert S % Sq == 0 and (Sq == S or Sq % 8 == 0), "bad q_tile"
    QT = S // Sq

    if head_block is None:
        HB = _pick_head_block(BH, S, Sq, D, Dp, itemsize,
                              compute_attn_weight, budget)
    else:
        HB = int(head_block)
    assert BH % HB == 0, "head_block must divide batch*heads"

    # Flatten (B, H) -> one leading axis (free reshape, no data movement).
    Qf = Q.reshape(BH, S, D)
    Kf = K.reshape(BH, S, D)
    Vf = V.reshape(BH, S, D)
    pQf = phi_Q.reshape(BH, S, Dp)
    pKf = phi_K.reshape(BH, S, Dp)

    full = lambda g, qi: (g, 0, 0)    # whole-sequence operands (fetched per g)
    qidx = lambda g, qi: (g, qi, 0)   # q-tiled operands / outputs

    in_specs = [
        pl.BlockSpec((HB, S, D), full),      # Q
        pl.BlockSpec((HB, S, D), full),      # K
        pl.BlockSpec((HB, S, D), full),      # V
        pl.BlockSpec((HB, Sq, Dp), qidx),    # phi_Q
        pl.BlockSpec((HB, S, Dp), full),     # phi_K
    ]
    out_specs = [pl.BlockSpec((HB, Sq, D), qidx)]
    out_shape = [jax.ShapeDtypeStruct((BH, S, D), Q.dtype)]
    if compute_attn_weight:
        out_specs.append(pl.BlockSpec((HB, Sq, S), qidx))
        out_shape.append(jax.ShapeDtypeStruct((BH, S, S), Q.dtype))

    scratch_shapes = [
        pltpu.VMEM((HB, S, 1), jnp.float32),    # softmax-ed scores s
        pltpu.VMEM((HB, 1, Dp), jnp.float32),   # K_sum
        pltpu.VMEM((HB, Dp, D), jnp.float32),   # KV
    ]

    vmem_limit = int(min(budget, max(
        32 * 2**20,
        _footprint_bytes(HB, S, Sq, D, Dp, itemsize, compute_attn_weight)
        + 16 * 2**20)))

    kernel = functools.partial(
        _linear_attention_kernel,
        embed_dim=embed_dim,
        compute_attn_weight=compute_attn_weight,
    )

    outs = pl.pallas_call(
        kernel,
        out_shape=tuple(out_shape),
        grid_spec=pltpu.PrefetchScalarGridSpec(
            num_scalar_prefetch=0,
            grid=(BH // HB, QT),
            in_specs=in_specs,
            out_specs=tuple(out_specs),
            scratch_shapes=scratch_shapes,
        ),
        compiler_params=pltpu.CompilerParams(
            dimension_semantics=("parallel", "arbitrary"),
            vmem_limit_bytes=vmem_limit),
    )(Qf, Kf, Vf, pQf, pKf)

    out = outs[0].reshape(B, H, S, D)
    attn = outs[1].reshape(B, H, S, S) if compute_attn_weight else None
    return out, attn


# ------------------------------- reference -----------------------------------
def _reference(Q, K, V, phi_Q, phi_K, embed_dim, compute_attn_weight=False):
    """Pure-JAX transcription of the PyTorch forward (for verification)."""
    phi_Kt = jnp.swapaxes(phi_K, -2, -1)                       # [B,H,Dp,S]
    q_probe = jnp.mean(Q, axis=-2) / (embed_dim ** 0.5)        # [B,H,D]
    score_l = jax.nn.softmax(
        jnp.einsum('bhd,bhsd->bhs', q_probe, K), axis=-1)      # [B,H,S]
    phi_Kt = phi_Kt * score_l[:, :, None, :]                   # [B,H,Dp,S]
    linear_attn = None
    if compute_attn_weight:
        linear_attn = phi_Q @ phi_Kt                           # [B,H,S,S]
        linear_attn = linear_attn / jnp.sum(linear_attn, -1, keepdims=True)
    K_sum = jnp.sum(phi_Kt, axis=-1, keepdims=True) + 1e-6     # [B,H,Dp,1]
    KV = phi_Kt @ V                                            # [B,H,Dp,D]
    out = phi_Q @ KV                                           # [B,H,S,D]
    out = out / (phi_Q @ K_sum)
    return out, linear_attn


if __name__ == "__main__":
    key = jax.random.PRNGKey(0)

    def make_inputs(k, B, H, S, D, Dp, dtype=jnp.float32):
        kq, kk, kv, kpq, kpk = jax.random.split(k, 5)
        Q = jax.random.normal(kq, (B, H, S, D), dtype=jnp.float32)
        K = jax.random.normal(kk, (B, H, S, D), dtype=jnp.float32)
        V = jax.random.normal(kv, (B, H, S, D), dtype=jnp.float32)
        phi_Q = jax.nn.softplus(jax.random.normal(kpq, (B, H, S, Dp)))
        phi_K = jax.nn.softplus(jax.random.normal(kpk, (B, H, S, Dp)))
        return tuple(x.astype(dtype) for x in (Q, K, V, phi_Q, phi_K))

    # ---- small shapes, single q-tile ---------------------------------------
    B, H, S, D, Dp = 2, 2, 16, 32, 64
    embed_dim = D
    Q, K, V, phi_Q, phi_K = make_inputs(key, B, H, S, D, Dp)

    out_fast, attn = linear_attention(Q, K, V, phi_Q, phi_K,
                                      embed_dim=embed_dim,
                                      compute_attn_weight=False)
    out_fast = jax.block_until_ready(out_fast)
    ref_out, _ = _reference(Q, K, V, phi_Q, phi_K, embed_dim)
    np.testing.assert_allclose(np.asarray(out_fast), np.asarray(ref_out),
                               rtol=2e-3, atol=2e-3)
    assert attn is None

    out2, attn2 = linear_attention(Q, K, V, phi_Q, phi_K,
                                   embed_dim=embed_dim,
                                   compute_attn_weight=True)
    out2 = jax.block_until_ready(out2)
    attn2 = jax.block_until_ready(attn2)
    ref_out2, ref_attn2 = _reference(Q, K, V, phi_Q, phi_K, embed_dim,
                                     compute_attn_weight=True)
    np.testing.assert_allclose(np.asarray(out2), np.asarray(ref_out2),
                               rtol=2e-3, atol=2e-3)
    np.testing.assert_allclose(np.asarray(attn2), np.asarray(ref_attn2),
                               rtol=2e-3, atol=2e-3)

    # ---- q-tiled path (QT=2): exercises pl.when(qi==0) scratch reuse --------
    B3, H3, S3 = 1, 2, 256
    Q3, K3, V3, pQ3, pK3 = make_inputs(jax.random.PRNGKey(1), B3, H3, S3, D, Dp)
    out3, _ = linear_attention(Q3, K3, V3, pQ3, pK3, embed_dim=embed_dim,
                               compute_attn_weight=False,
                               head_block=2, q_tile=128)
    out3 = jax.block_until_ready(out3)
    ref3, _ = _reference(Q3, K3, V3, pQ3, pK3, embed_dim)
    np.testing.assert_allclose(np.asarray(out3), np.asarray(ref3),
                               rtol=2e-3, atol=2e-3)

    out4, attn4 = linear_attention(Q3, K3, V3, pQ3, pK3, embed_dim=embed_dim,
                                   compute_attn_weight=True, q_tile=128)
    out4 = jax.block_until_ready(out4)
    attn4 = jax.block_until_ready(attn4)
    ref4, ref_attn4 = _reference(Q3, K3, V3, pQ3, pK3, embed_dim,
                                 compute_attn_weight=True)
    np.testing.assert_allclose(np.asarray(out4), np.asarray(ref4),
                               rtol=2e-3, atol=2e-3)
    np.testing.assert_allclose(np.asarray(attn4), np.asarray(ref_attn4),
                               rtol=2e-3, atol=2e-3)

    # ---- bf16 path (MXU operands stay bf16; KV kept in f32 scratch) --------
    Qb, Kb, Vb, pQb, pKb = (x.astype(jnp.bfloat16)
                            for x in (Q, K, V, phi_Q, phi_K))
    out_b, _ = linear_attention(Qb, Kb, Vb, pQb, pKb, embed_dim=embed_dim)
    out_b = jax.block_until_ready(out_b)
    ref_b, _ = _reference(*(x.astype(jnp.float32)
                            for x in (Qb, Kb, Vb, pQb, pKb)), embed_dim)
    np.testing.assert_allclose(np.asarray(out_b, dtype=np.float32),
                               np.asarray(ref_b), rtol=5e-2, atol=5e-2)

    print("KERNEL_OK")
</pallas_src>

<mosaic_0001>
module attributes {stable_mosaic.version = 11 : i64} {
  func.func @_linear_attention_kernel(%arg0: i32, %arg1: i32, %arg2: memref<2x16x32xf32, #tpu.memory_space<vmem>>, %arg3: memref<2x16x32xf32, #tpu.memory_space<vmem>>, %arg4: memref<2x16x32xf32, #tpu.memory_space<vmem>>, %arg5: memref<2x16x64xf32, #tpu.memory_space<vmem>>, %arg6: memref<2x16x64xf32, #tpu.memory_space<vmem>>, %arg7: memref<2x16x32xf32, #tpu.memory_space<vmem>>, %arg8: memref<2x16x1xf32, #tpu.memory_space<vmem>>, %arg9: memref<2x1x64xf32, #tpu.memory_space<vmem>>, %arg10: memref<2x64x32xf32, #tpu.memory_space<vmem>>) attributes {dimension_semantics = [#tpu.dimension_semantics<parallel>, #tpu.dimension_semantics<arbitrary>], iteration_bounds = array<i64: 2, 1>, scalar_prefetch = 0 : i64, scratch_operands = 3 : i64, tpu.core_type = #tpu.core_type<tc>, window_params = [{transform_indices = @transform_0, window_bounds = array<i64: 2, 16, 32>}, {transform_indices = @transform_1, window_bounds = array<i64: 2, 16, 32>}, {transform_indices = @transform_2, window_bounds = array<i64: 2, 16, 32>}, {transform_indices = @transform_3, window_bounds = array<i64: 2, 16, 64>}, {transform_indices = @transform_4, window_bounds = array<i64: 2, 16, 64>}, {transform_indices = @transform_5, window_bounds = array<i64: 2, 16, 32>}]} {
    %c0_i32 = arith.constant 0 : i32
    %0 = arith.cmpi eq, %arg1, %c0_i32 : i32
    %1 = arith.extui %0 : i1 to i32
    %c0_i32_0 = arith.constant 0 : i32
    %2 = arith.cmpi ne, %1, %c0_i32_0 : i32
    scf.if %2 {
      %c0_i32_3 = arith.constant 0 : i32
      %c2_i32_4 = arith.constant 2 : i32
      %4 = arith.addi %c0_i32_3, %c2_i32_4 : i32
      %c1_i32_5 = arith.constant 1 : i32
      scf.for %arg11 = %c0_i32_3 to %4 step %c1_i32_5  : i32 {
        %5 = arith.index_cast %arg11 : i32 to index
        %c0 = arith.constant 0 : index
        %c0_7 = arith.constant 0 : index
        %6 = vector.load %arg2[%5, %c0, %c0_7] : memref<2x16x32xf32, #tpu.memory_space<vmem>>, vector<1x16x32xf32>
        %7 = vector.shape_cast %6 : vector<1x16x32xf32> to vector<16x32xf32>
        %8 = arith.index_cast %arg11 : i32 to index
        %c0_8 = arith.constant 0 : index
        %c0_9 = arith.constant 0 : index
        %9 = vector.load %arg3[%8, %c0_8, %c0_9] : memref<2x16x32xf32, #tpu.memory_space<vmem>>, vector<1x16x32xf32>
        %10 = vector.shape_cast %9 : vector<1x16x32xf32> to vector<16x32xf32>
        %11 = arith.index_cast %arg11 : i32 to index
        %c0_10 = arith.constant 0 : index
        %c0_11 = arith.constant 0 : index
        %12 = vector.load %arg4[%11, %c0_10, %c0_11] : memref<2x16x32xf32, #tpu.memory_space<vmem>>, vector<1x16x32xf32>
        %13 = vector.shape_cast %12 : vector<1x16x32xf32> to vector<16x32xf32>
        %14 = arith.index_cast %arg11 : i32 to index
        %c0_12 = arith.constant 0 : index
        %c0_13 = arith.constant 0 : index
        %15 = vector.load %arg6[%14, %c0_12, %c0_13] : memref<2x16x64xf32, #tpu.memory_space<vmem>>, vector<1x16x64xf32>
        %16 = vector.shape_cast %15 : vector<1x16x64xf32> to vector<16x64xf32>
        %cst = arith.constant dense<0.000000e+00> : vector<32xf32>
        %17 = vector.multi_reduction <add>, %7, %cst [0] : vector<16x32xf32> to vector<32xf32>
        %18 = vector.shape_cast %17 : vector<32xf32> to vector<1x32xf32>
        %cst_14 = arith.constant 0.0110485433 : f32
        %19 = vector.broadcast %cst_14 : f32 to vector<1x32xf32>
        %20 = arith.mulf %18, %19 : vector<1x32xf32>
        %21 = vector.broadcast %20 : vector<1x32xf32> to vector<16x32xf32>
        %22 = arith.mulf %10, %21 : vector<16x32xf32>
        %cst_15 = arith.constant dense<0.000000e+00> : vector<16xf32>
        %23 = vector.multi_reduction <add>, %22, %cst_15 [1] : vector<16x32xf32> to vector<16xf32>
        %24 = vector.shape_cast %23 : vector<16xf32> to vector<16x1xf32>
        %cst_16 = arith.constant dense<0xFF800000> : vector<1xf32>
        %25 = vector.multi_reduction <maximumf>, %24, %cst_16 [0] : vector<16x1xf32> to vector<1xf32>
        %26 = vector.shape_cast %25 : vector<1xf32> to vector<1x1xf32>
        %27 = vector.broadcast %26 : vector<1x1xf32> to vector<16x1xf32>
        %28 = arith.subf %24, %27 : vector<16x1xf32>
        %29 = math.exp %28 : vector<16x1xf32>
        %cst_17 = arith.constant dense<0.000000e+00> : vector<1xf32>
        %30 = vector.multi_reduction <add>, %29, %cst_17 [0] : vector<16x1xf32> to vector<1xf32>
        %31 = vector.shape_cast %30 : vector<1xf32> to vector<1x1xf32>
        %32 = tpu.reciprocal %31 {approx = true} : vector<1x1xf32> -> vector<1x1xf32>
        %33 = vector.broadcast %32 : vector<1x1xf32> to vector<16x1xf32>
        %34 = arith.mulf %29, %33 : vector<16x1xf32>
        %35 = vector.broadcast %34 : vector<16x1xf32> to vector<16x64xf32>
        %36 = arith.mulf %16, %35 : vector<16x64xf32>
        %cst_18 = arith.constant dense<0.000000e+00> : vector<64xf32>
        %37 = vector.multi_reduction <add>, %36, %cst_18 [0] : vector<16x64xf32> to vector<64xf32>
        %38 = vector.shape_cast %37 : vector<64xf32> to vector<1x64xf32>
        %cst_19 = arith.constant 9.99999997E-7 : f32
        %39 = vector.broadcast %cst_19 : f32 to vector<1x64xf32>
        %40 = arith.addf %38, %39 : vector<1x64xf32>
        %cst_20 = arith.constant dense<0.000000e+00> : vector<64x32xf32>
        %41 = tpu.matmul %36, %13, %cst_20 {dimension_numbers = #tpu.dot_dimension_numbers<[0], [0], [1], [1], [0, 1, 1, 1], [], []>} : vector<16x64xf32>, vector<16x32xf32>, vector<64x32xf32> -> vector<64x32xf32>
        %42 = arith.index_cast %arg11 : i32 to index
        %c0_21 = arith.constant 0 : index
        %c0_22 = arith.constant 0 : index
        %43 = vector.load %arg8[%42, %c0_21, %c0_22] : memref<2x16x1xf32, #tpu.memory_space<vmem>>, vector<1x16x1xf32>
        %44 = vector.shape_cast %43 : vector<1x16x1xf32> to vector<16x1xf32>
        %45 = vector.shape_cast %34 : vector<16x1xf32> to vector<1x16x1xf32>
        tpu.vector_store %arg8[%42, %c0_21, %c0_22], %45 {strides = array<i32>} : memref<2x16x1xf32, #tpu.memory_space<vmem>>, vector<1x16x1xf32>,
        %46 = arith.index_cast %arg11 : i32 to index
        %c0_23 = arith.constant 0 : index
        %c0_24 = arith.constant 0 : index
        %47 = vector.load %arg9[%46, %c0_23, %c0_24] : memref<2x1x64xf32, #tpu.memory_space<vmem>>, vector<1x1x64xf32>
        %48 = vector.shape_cast %47 : vector<1x1x64xf32> to vector<1x64xf32>
        %49 = vector.shape_cast %40 : vector<1x64xf32> to vector<1x1x64xf32>
        tpu.vector_store %arg9[%46, %c0_23, %c0_24], %49 {strides = array<i32>} : memref<2x1x64xf32, #tpu.memory_space<vmem>>, vector<1x1x64xf32>,
        %50 = arith.index_cast %arg11 : i32 to index
        %c0_25 = arith.constant 0 : index
        %c0_26 = arith.constant 0 : index
        %51 = vector.load %arg10[%50, %c0_25, %c0_26] : memref<2x64x32xf32, #tpu.memory_space<vmem>>, vector<1x64x32xf32>
        %52 = vector.shape_cast %51 : vector<1x64x32xf32> to vector<64x32xf32>
        %53 = vector.shape_cast %41 : vector<64x32xf32> to vector<1x64x32xf32>
        tpu.vector_store %arg10[%50, %c0_25, %c0_26], %53 {strides = array<i32>} : memref<2x64x32xf32, #tpu.memory_space<vmem>>, vector<1x64x32xf32>,
      }
      %c2_i32_6 = arith.constant 2 : i32
    } else {
    }
    %c0_i32_1 = arith.constant 0 : i32
    %c2_i32 = arith.constant 2 : i32
    %3 = arith.addi %c0_i32_1, %c2_i32 : i32
    %c1_i32 = arith.constant 1 : i32
    scf.for %arg11 = %c0_i32_1 to %3 step %c1_i32  : i32 {
      %4 = arith.index_cast %arg11 : i32 to index
      %c0 = arith.constant 0 : index
      %c0_3 = arith.constant 0 : index
      %5 = vector.load %arg5[%4, %c0, %c0_3] : memref<2x16x64xf32, #tpu.memory_space<vmem>>, vector<1x16x64xf32>
      %6 = vector.shape_cast %5 : vector<1x16x64xf32> to vector<16x64xf32>
      %7 = arith.index_cast %arg11 : i32 to index
      %c0_4 = arith.constant 0 : index
      %c0_5 = arith.constant 0 : index
      %8 = vector.load %arg10[%7, %c0_4, %c0_5] : memref<2x64x32xf32, #tpu.memory_space<vmem>>, vector<1x64x32xf32>
      %9 = vector.shape_cast %8 : vector<1x64x32xf32> to vector<64x32xf32>
      %cst = arith.constant dense<0.000000e+00> : vector<16x32xf32>
      %10 = tpu.matmul %6, %9, %cst {dimension_numbers = #tpu.dot_dimension_numbers<[1], [0], [0], [1], [0, 0, 1, 1], [], []>} : vector<16x64xf32>, vector<64x32xf32>, vector<16x32xf32> -> vector<16x32xf32>
      %11 = arith.index_cast %arg11 : i32 to index
      %c0_6 = arith.constant 0 : index
      %c0_7 = arith.constant 0 : index
      %12 = vector.load %arg9[%11, %c0_6, %c0_7] : memref<2x1x64xf32, #tpu.memory_space<vmem>>, vector<1x1x64xf32>
      %13 = vector.shape_cast %12 : vector<1x1x64xf32> to vector<1x64xf32>
      %14 = vector.broadcast %13 : vector<1x64xf32> to vector<16x64xf32>
      %15 = arith.mulf %6, %14 : vector<16x64xf32>
      %cst_8 = arith.constant dense<0.000000e+00> : vector<16xf32>
      %16 = vector.multi_reduction <add>, %15, %cst_8 [1] : vector<16x64xf32> to vector<16xf32>
      %17 = vector.shape_cast %16 : vector<16xf32> to vector<16x1xf32>
      %18 = tpu.reciprocal %17 {approx = true} : vector<16x1xf32> -> vector<16x1xf32>
      %19 = vector.broadcast %18 : vector<16x1xf32> to vector<16x32xf32>
      %20 = arith.mulf %10, %19 : vector<16x32xf32>
      %21 = arith.index_cast %arg11 : i32 to index
      %c0_9 = arith.constant 0 : index
      %c0_10 = arith.constant 0 : index
      %22 = vector.load %arg7[%21, %c0_9, %c0_10] : memref<2x16x32xf32, #tpu.memory_space<vmem>>, vector<1x16x32xf32>
      %23 = vector.shape_cast %22 : vector<1x16x32xf32> to vector<16x32xf32>
      %24 = vector.shape_cast %20 : vector<16x32xf32> to vector<1x16x32xf32>
      tpu.vector_store %arg7[%21, %c0_9, %c0_10], %24 {strides = array<i32>} : memref<2x16x32xf32, #tpu.memory_space<vmem>>, vector<1x16x32xf32>,
    }
    %c2_i32_2 = arith.constant 2 : i32
    return
  }
  func.func @transform_0(%arg0: i32, %arg1: i32) -> (i32, i32, i32) {
    %c0_i32 = arith.constant 0 : i32
    %c0_i32_0 = arith.constant 0 : i32
    %c0_i32_1 = arith.constant 0 : i32
    return %arg0, %c0_i32, %c0_i32_0 : i32, i32, i32
  }
  func.func @transform_1(%arg0: i32, %arg1: i32) -> (i32, i32, i32) {
    %c0_i32 = arith.constant 0 : i32
    %c0_i32_0 = arith.constant 0 : i32
    %c0_i32_1 = arith.constant 0 : i32
    return %arg0, %c0_i32, %c0_i32_0 : i32, i32, i32
  }
  func.func @transform_2(%arg0: i32, %arg1: i32) -> (i32, i32, i32) {
    %c0_i32 = arith.constant 0 : i32
    %c0_i32_0 = arith.constant 0 : i32
    %c0_i32_1 = arith.constant 0 : i32
    return %arg0, %c0_i32, %c0_i32_0 : i32, i32, i32
  }
  func.func @transform_3(%arg0: i32, %arg1: i32) -> (i32, i32, i32) {
    %c0_i32 = arith.constant 0 : i32
    %c0_i32_0 = arith.constant 0 : i32
    return %arg0, %arg1, %c0_i32 : i32, i32, i32
  }
  func.func @transform_4(%arg0: i32, %arg1: i32) -> (i32, i32, i32) {
    %c0_i32 = arith.constant 0 : i32
    %c0_i32_0 = arith.constant 0 : i32
    %c0_i32_1 = arith.constant 0 : i32
    return %arg0, %c0_i32, %c0_i32_0 : i32, i32, i32
  }
  func.func @transform_5(%arg0: i32, %arg1: i32) -> (i32, i32, i32) {
    %c0_i32 = arith.constant 0 : i32
    %c0_i32_0 = arith.constant 0 : i32
    return %arg0, %arg1, %c0_i32 : i32, i32, i32
  }
}

</mosaic_0001>

<bundles_post_ra>
// kernel: tpu_custom_call.1
= control target key start
LH: loop header
LB: loop body
LE: loop exit
PB: predicated region body
PF: predicated region fallthrough
CT: control target
= control target key end

     0   :  { %s1892_s0 = inlined_call_operand.hbm [shape: f32[4,16,32], index: 0, kind: input, shape index: {}]   ;;  %s1893_s1 = inlined_call_operand.hbm [shape: f32[4,16,32], index: 1, kind: input, shape index: {}]   ;;  %s1894_s2 = inlined_call_operand.hbm [shape: f32[4,16,32], index: 2, kind: input, shape index: {}]   ;;  %s1895_s3 = inlined_call_operand.hbm [shape: f32[4,16,64], index: 3, kind: input, shape index: {}]   ;;  %s1896_s4 = inlined_call_operand.hbm [shape: f32[4,16,64], index: 4, kind: input, shape index: {}]   ;;  %s1897_s5 = inlined_call_operand.hbm [shape: f32[4,16,32], index: 5, kind: output, shape index: {}]  }
   0x1   :  { %1909 = sst [smem:[#allocation25_spill]] %s1893_s1 }
   0x2   :  { %1910 = sst [smem:[#allocation26_spill]] %s1895_s3 }
   0x3   :  { %1911 = sst [smem:[#allocation27_spill]] %s1897_s5 }
   0x4   :  { %10 = vsyncpa [#allocation6], 0 }
   0x5   :  { %12 = vsyncpa [#allocation6 + $0x1], 0 }
   0x6   :  { %13 = vsyncpa [#allocation9], 0 }
   0x7   :  { %15 = vsyncpa [#allocation9 + $0x1], 0 }
   0x8   :  { %16 = vsyncpa [#allocation12], 0 }
   0x9   :  { %18 = vsyncpa [#allocation12 + $0x1], 0 }
   0xa   :  { %19 = vsyncpa [#allocation7], 0 }
   0xb   :  { %21 = vsyncpa [#allocation7 + $0x1], 0  ;;  %s1553_s18 = smov 0   ;;  %s1555_s19 = smov 0  }
   0xc   :  { %s1557_s20 = smov 0   ;;  %s1559_s21 = smov 0  }
   0xd   :  { %s1561_s22 = smov 0   ;;  %s1563_s23 = smov 0  }
   0xe LB: > { %1912 = sst [smem:[#allocation19_spill]] %s1483_s18  ;;  %s1584_s24 = sadd.s32 4294967295, %s1503_s23   ;;  %s1503_s23 = sphi %s1563_s23, %s27_s23   ;;  %s1499_s22 = sphi %s1561_s22, %s1937_s22   ;;  %s1495_s21 = sphi %s1559_s21, %s1936_s21   ;;  %s1491_s20 = sphi %s1557_s20, %s1940_s20   ;;  %s1487_s19 = sphi %s1555_s19, %s1939_s19   ;;  %s1483_s18 = sphi %s1553_s18, %s1938_s18  }
   0xf   : > { %1913 = sst [smem:[#allocation20_spill]] %s1499_s22  ;;  %s1032_s25 = sadd.s32 4294967294, %s1503_s23  }
  0x10   : > { %1914 = sst [smem:[#allocation21_spill]] %s1503_s23  ;;  %s39_s26 = sadd.s32 1, %s1499_s22 }
  0x11   : > { %s46_s27 = sadd.s32 1, %s1491_s20  ;;  %p41_p0 = scmp.ge.s32.totalorder %s39_s26, 2 }
  0x12   : > { %p53_p1 = scmp.ne.s32.totalorder %s1491_s20, %s1487_s19  ;;  %p54_p2 = scmp.eq.s32.totalorder %s1503_s23, 0 }
  0x13   : > { %p59_p3 = scmp.ne.s32.totalorder %s1487_s19, %s1483_s18  ;;  %s1942_s26 = smov (%p41_p0, %s39_s26), 0 }
  0x14   : > { %1915 = sst [smem:[#allocation22_spill]] %s1942_s26  ;;  %p1596_p4 = por %p54_p2, %p53_p1 }
  0x15   : > { %p60_p5 = scmp.eq.s32.totalorder %s1584_s24, 0  ;;  %s43_s29 = ssub.s32 %s1499_s22, %s1942_s26 }
  0x16   : > { %p191_p6 = scmp.eq.s32.totalorder %s1584_s24, 1  ;;  %p44_p7 = scmp.eq.s32.totalorder %s43_s29, 0 }
  0x17   : > { %p1604_p8 = por %p60_p5, %p59_p3  ;;  %p197_p10 = scmp.eq.s32.totalorder %s1032_s25, 1 }
  0x18   : > { %p1608_p9 = por %p191_p6, %p53_p1  ;;  %p1186_p13 = scmp.lt.s32.totalorder %s1503_s23, 2 }
  0x19   : > { %s1613_s7 = scalar_select %p44_p7, %s1491_s20, %s46_s27  }
  0x1a   : > { %p1615_p11 = por %p197_p10, %p59_p3  ;;  %s1898_s9 = sand.u32 1, %s1491_s20  }
  0x1b   : > { %1919 = sst [smem:[#allocation23_spill]] %s1613_s7  ;;  %s1624_s10 = sshll.u32 %s1898_s9, 5 }
  0x1c   : > { %s1920_s8 = scalar_select %p1615_p11, 1, 0 }
  0x1d   : > { %s1627_s11 = sshll.u32 %s1499_s22, 9  ;;  %p1631_p0 = pnand %p1186_p13, %p1596_p4 }
  0x1e   : > { %1921 = sst [smem:[#allocation24_spill]] %s1920_s8  ;;  %s1899_s13 = sand.u32 1, %s1503_s23  }
  0x1f   : > { %s1923_s1 = sld [smem:[#allocation25_spill]]  ;;  %s243_s17 = scalar_lea.vmem [#allocation8], %s1624_s10 }
  0x20   : > { %s251_s25 = sshll.u32 %s243_s17, 4  ;;  %p1055_p1 = scmp.ge.s32.totalorder %s1503_s23, 1  ;;  %s252_s25 = int_to_ptr.vmem [resolvable:$true] %s251_s25 }
  0x21   : > { %p327_p2 = scmp.lt.s32.totalorder %s1503_s23, 3  ;;  %s1645_s27 = scalar_lea.sflag [#allocation9], %s1899_s13 }
  0x22   : > { %p1649_p3 = pneg %p1631_p0  ;;  %s1280_s29 = scalar_lea.vmem %s252_s25, 512 }
  0x23   : > { %p1281_p4 = scmp.ne.s32.totalorder %s252_s25, %s1280_s29  ;;  %s1513_s14 = smov [#allocation8]  }
  0x24   : > { %s1285_s15 = sshll.u32 %s1513_s14, 4  ;;  %s1286_s15 = int_to_ptr.vmem [resolvable:$false] %s1285_s15 }
  0x25   : > { %s250_s16 = scalar_lea.hbm %s1923_s1, %s1627_s11  ;;  %p1283_p5 = pnand %p1281_p4, %p1649_p3 }
  0x26   : > { %s1287_s17 = scalar_lea.vmem %s1286_s15, 1024  ;;  %p1288_p7 = scmp.lt.s32.totalorder %s252_s25, %s1286_s15 }
  0x27   : > { %p1284_p6 = pneg %p1283_p5  ;;  %p1289_p10 = scmp.lt.s32.totalorder %s1287_s17, %s1280_s29 }
  0x29   : > { %p1290_p13 = por %p1289_p10, %p1288_p7 }
  0x2b   : > { %p1291_p12 = pnand %p1290_p13, %p1284_p6 }
  0x2d   : > { %1294 = shalt.err (!%p1291_p12)
}
  0x2e   : > { %s1903_s9 = smov 128   ;;  %s1515_s13 = smov 8  }
  0x2f   : > { %1172 = dma.hbm_to_vmem [thread:$0]  (!%p1631_p0), %s250_s16, 512, %s252_s25, %s1645_s27, %s1903_s9, %s1903_s9, %s1515_s13  }
  0x30   : > { %p1665_p4 = pnand %p1055_p1, %p327_p2  ;;  %s1926_s3 = sld [smem:[#allocation26_spill]] }
  0x31   : > { %s287_s1 = scalar_lea.vmem [#allocation11], %s1624_s10  ;;  %s1927_s22 = sand.u32 1, %s1503_s23  }
  0x32   : > { %s297_s26 = sshll.u32 %s287_s1, 4  ;;  %s1676_s7 = scalar_lea.sflag [#allocation12], %s1927_s22  ;;  %s298_s26 = int_to_ptr.vmem [resolvable:$true] %s297_s26 }
  0x33   : > { %s1308_s8 = scalar_lea.vmem %s298_s26, 512  ;;  %s1516_s16 = smov [#allocation11]  }
  0x34   : > { %p1309_p12 = scmp.ne.s32.totalorder %s298_s26, %s1308_s8  ;;  %s1313_s25 = sshll.u32 %s1516_s16, 4  ;;  %s1314_s25 = int_to_ptr.vmem [resolvable:$false] %s1313_s25 }
  0x35   : > { %s1315_s9 = scalar_lea.vmem %s1314_s25, 1024  ;;  %p1316_p1 = scmp.lt.s32.totalorder %s298_s26, %s1314_s25 }
  0x36   : > { %s296_s17 = scalar_lea.hbm %s1926_s3, %s1627_s11  ;;  %p1311_p5 = pnand %p1309_p12, %p1649_p3 }
  0x37   : > { %p1317_p2 = scmp.lt.s32.totalorder %s1315_s9, %s1308_s8 }
  0x38   : > { %p1312_p6 = pneg %p1311_p5 }
  0x39   : > { %p1318_p7 = por %p1317_p2, %p1316_p1 }
  0x3b   : > { %p1319_p10 = pnand %p1318_p7, %p1312_p6 }
  0x3d   : > { %1322 = shalt.err (!%p1319_p10)
}
  0x3e   : > { %s1928_s1 = smov 128   ;;  %s228_s15 = scalar_lea.hbm %s1892_s0, %s1627_s11 }
  0x3f   : > { %1178 = dma.hbm_to_vmem [thread:$0]  (!%p1631_p0), %s296_s17, 512, %s298_s26, %s1676_s7, %s1928_s1, %s1928_s1, %s1515_s13  }
  0x40   : > { %s221_s16 = scalar_lea.vmem [#allocation5], %s1624_s10  ;;  %s1929_s9 = sand.u32 1, %s1491_s20  }
  0x41   : > { %s229_s8 = sshll.u32 %s221_s16, 4  ;;  %s218_s25 = scalar_lea.sflag [#allocation6], %s1929_s9  ;;  %s230_s8 = int_to_ptr.vmem [resolvable:$true] %s229_s8 }
  0x42   : > { %s1336_s3 = scalar_lea.vmem %s230_s8, 512  ;;  %s1517_s23 = smov [#allocation5]  }
  0x43   : > { %p1337_p13 = scmp.ne.s32.totalorder %s230_s8, %s1336_s3  ;;  %s1341_s18 = sshll.u32 %s1517_s23, 4  ;;  %s1342_s18 = int_to_ptr.vmem [resolvable:$false] %s1341_s18 }
  0x44   : > { %s1343_s5 = scalar_lea.vmem %s1342_s18, 1024  ;;  %p1344_p6 = scmp.lt.s32.totalorder %s230_s8, %s1342_s18 }
  0x45   : > { %p1339_p12 = pnand %p1337_p13, %p1649_p3  ;;  %p1345_p1 = scmp.lt.s32.totalorder %s1343_s5, %s1336_s3 }
  0x47   : > { %p1340_p5 = pneg %p1339_p12  ;;  %p1346_p2 = por %p1345_p1, %p1344_p6 }
  0x49   : > { %p1347_p7 = pnand %p1346_p2, %p1340_p5 }
  0x4b   : > { %1350 = shalt.err (!%p1347_p7)
}
  0x4c   : > { %1169 = dma.hbm_to_vmem [thread:$0]  (!%p1631_p0), %s228_s15, 512, %s230_s8, %s218_s25, %s1928_s1, %s1928_s1, %s1515_s13  }
  0x4d   : > { %s272_s23 = scalar_lea.hbm %s1894_s2, %s1627_s11  ;;  %s265_s22 = scalar_lea.vmem [#allocation10], %s1624_s10 }
  0x4e   : > { %s273_s14 = sshll.u32 %s265_s22, 4  ;;  %s1518_s5 = smov [#allocation10]   ;;  %s274_s14 = int_to_ptr.vmem [resolvable:$true] %s273_s14 }
  0x4f   : > { %s1364_s3 = scalar_lea.vmem %s274_s14, 512  ;;  %s1369_s18 = sshll.u32 %s1518_s5, 4  ;;  %s1370_s18 = int_to_ptr.vmem [resolvable:$false] %s1369_s18 }
  0x50   : > { %p1365_p10 = scmp.ne.s32.totalorder %s274_s14, %s1364_s3  ;;  %s1371_s16 = scalar_lea.vmem %s1370_s18, 1024 }
  0x51   : > { %p1372_p5 = scmp.lt.s32.totalorder %s274_s14, %s1370_s18  ;;  %p1373_p6 = scmp.lt.s32.totalorder %s1371_s16, %s1364_s3 }
  0x52   : > { %p1367_p13 = pnand %p1365_p10, %p1649_p3 }
  0x53   : > { %p1374_p1 = por %p1373_p6, %p1372_p5 }
  0x54   : > { %p1368_p12 = pneg %p1367_p13 }
  0x56   : > { %p1375_p2 = pnand %p1374_p1, %p1368_p12 }
  0x58   : > { %1378 = shalt.err (!%p1375_p2)
}
  0x59   : > { %1175 = dma.hbm_to_vmem [thread:$0]  (!%p1631_p0), %s272_s23, 512, %s274_s14, %s1645_s27, %s1928_s1, %s1928_s1, %s1515_s13  }
  0x5a   : > { %s318_s9 = scalar_lea.hbm %s1896_s4, %s1627_s11  ;;  %s311_s25 = scalar_lea.vmem [#allocation13], %s1624_s10 }
  0x5b   : > { %s319_s26 = sshll.u32 %s311_s25, 4  ;;  %s1519_s22 = smov [#allocation13]   ;;  %s320_s26 = int_to_ptr.vmem [resolvable:$true] %s319_s26 }
  0x5c   : > { %s1392_s17 = scalar_lea.vmem %s320_s26, 512  ;;  %s1397_s3 = sshll.u32 %s1519_s22, 4  ;;  %s1398_s3 = int_to_ptr.vmem [resolvable:$false] %s1397_s3 }
  0x5d   : > { %p1393_p7 = scmp.ne.s32.totalorder %s320_s26, %s1392_s17  ;;  %s1399_s5 = scalar_lea.vmem %s1398_s3, 1024 }
  0x5e   : > { %p1400_p12 = scmp.lt.s32.totalorder %s320_s26, %s1398_s3  ;;  %p1401_p5 = scmp.lt.s32.totalorder %s1399_s5, %s1392_s17 }
  0x5f   : > { %p1395_p10 = pnand %p1393_p7, %p1649_p3 }
  0x60   : > { %p1402_p6 = por %p1401_p5, %p1400_p12 }
  0x61   : > { %p1396_p13 = pneg %p1395_p10 }
  0x63   : > { %p1403_p1 = pnand %p1402_p6, %p1396_p13 }
  0x65   : > { %1406 = shalt.err (!%p1403_p1)
}
  0x66   : > { %1181 = dma.hbm_to_vmem [thread:$0]  (!%p1631_p0), %s318_s9, 512, %s320_s26, %s1676_s7, %s1928_s1, %s1928_s1, %s1515_s13  }
  0x67   : > { %331 = sbr.rel (%p1665_p4) target bundleno = 930 (0x3a2), region = 40  ;;  %s1729_s10 = sand.u32 (!%p1665_p4), 1, %s1487_s19  }
  0x68   : > { %s1732_s11 = sshll.u32 (!%p1665_p4), %s1729_s10, 5  ;;  %s334_s27 = scalar_lea.sflag (!%p1665_p4), [#allocation6], %s1729_s10 }
  0x69   : > { %s337_s28 = scalar_lea.vmem (!%p1665_p4), [#allocation5], %s1732_s11 }
  0x6c   : > { %1466 = dma.done.wait (%p1604_p8), %s334_s27, 512  }
  0x6d   : > { %1468 = vsyncadd (%p1604_p8), %s334_s27, 4294966784  ;;  %s342_s7 = sand.u32 1, %s1584_s24   ;;  %s346_s13 = scalar_lea.vmem [#allocation8], %s1732_s11 }
  0x6e   : > { %s343_s12 = scalar_lea.sflag [#allocation9], %s342_s7 }
  0x6f   : > { %1470 = dma.done.wait (%p1604_p8), %s343_s12, 1024  }
  0x70   : > { %1472 = vsyncadd (%p1604_p8), %s343_s12, 4294966272  ;;  %s355_s29 = scalar_lea.vmem [#allocation10], %s1732_s11  ;;  %s361_s1 = scalar_lea.sflag [#allocation12], %s342_s7 }
  0x71   : > { %s364_s23 = scalar_lea.vmem [#allocation11], %s1732_s11 }
  0x72   : > { %1474 = dma.done.wait (%p1604_p8), %s361_s1, 1024  }
  0x73   : > { %1476 = vsyncadd (%p1604_p8), %s361_s1, 4294966272  ;;  %s373_s24 = scalar_lea.vmem [#allocation13], %s1732_s11  ;;  %s419_s14 = scalar_lea.vmem [#allocation14], %s1732_s11 }
  0x74   : > { %s1754_s18 = smov 0  }
  0x75 LB: >> { %s1760_s16 = sshll.u32 %s1507_s18, 4  ;;  %vm451_vm0 = vcmask 261120   ;;  %vm495_vm1 = vcmask 523264   ;;  %vm673_vm2 = vcmask 516096   ;;  %s672_s25 = scalar_lea.vmem [#allocation3], %s1507_s18  ;;  %vm538_vm3 = vcmask 130048   ;;  %s1507_s18 = sphi %s1754_s18, %s437_s18  }
  0x76   : >> { %s439_s30 = scalar_lea.vmem %s337_s28, %s1760_s16 [#allocation5]  ;;  %s442_s15 = scalar_lea.vmem %s346_s13, %s1760_s16 [#allocation8] }
  0x77   : >> { %v440_v0 = vld [vmem:[%s439_s30] sm:$0xff]  ;;  %v441_v1 = vld [vmem:[%s439_s30 + $0x8] sm:$0xff]  ;;  %s448_s8 = scalar_lea.vmem %s373_s24, %s1760_s16 [#allocation13]  ;;  %s445_s9 = scalar_lea.vmem %s355_s29, %s1760_s16 [#allocation10] }
  0x78   : >> { %v452_v2 = vsel %vm451_vm0, %v440_v0, 0.0  ;;  %v453_v3 = vsel %vm451_vm0, %v441_v1, 0.0  ;;  %v443_v11 = vld [vmem:[%s442_s15] sm:$0xff]  ;;  %v444_v12 = vld [vmem:[%s442_s15 + $0x8] sm:$0xff]  ;;  %s1071_s26 = sshll.u32 %s1507_s18, 6  ;;  %s437_s18 = sadd.s32 1, %s1507_s18  }
  0x79   : >> { %v454_v4 = vadd.f32 %v453_v3, %v452_v2  ;;  %v449_v41 = vld [vmem:[%s448_s8] sm:$0xff]  ;;  %v450_v42 = vld [vmem:[%s448_s8 + $0x8] sm:$0xff]  ;;  %s676_s17 = scalar_lea.vmem [#allocation4], %s1071_s26  ;;  %p434_p8 = scmp.ge.s32.totalorder %s437_s18, 2  }
  0x7a   : >> { %v447_v45 = vld [vmem:[%s445_s9 + $0x8] sm:$0xff]  ;;  %v446_v46 = vld [vmem:[%s445_s9] sm:$0xff]  ;;  %s1801_s22 = smov (%p434_p8), 0  }
  0x7b   : >> { %v455_v5 = vrot.slane %v454_v4, 4  ;;  %1115 = vmatprep.subr.mxu0 %v447_v45  ;;  %1150 = vmatprep.subr.mxu1 %v447_v45 }
  0x7c   : >> { %1116 = vmatpush3.msra.mxu0 %v447_v45  ;;  %1152 = vmatpush3.msra.mxu1 %v447_v45 }
  0x7d   : >> { %v456_v6 = vadd.f32 %v455_v5, %v454_v4  ;;  %1117 = vmatprep.subr.mxu0 %v446_v46  ;;  %1151 = vmatprep.subr.mxu1 %v446_v46 }
  0x7e   : >> { %1118 = vmatpush3.msra.mxu0 %v446_v46  ;;  %1153 = vmatpush3.msra.mxu1 %v446_v46 }
  0x7f   : >> { %v457_v7 = vrot.slane %v456_v6, 2 }
  0x81   : >> { %v458_v8 = vadd.f32 %v457_v7, %v456_v6 }
  0x83   : >> { %v459_v9 = vrot.slane %v458_v8, 1 }
  0x85   : >> { %v460_v10 = vadd.f32 %v459_v9, %v458_v8 }
  0x87   : >> { %v461_v13 = vmul.f32 0.011048543, %v460_v10 }
  0x89   : >> { %v462_v14 = vmul.f32 %v461_v13, %v443_v11  ;;  %v463_v15 = vmul.f32 %v461_v13, %v444_v12 }
  0x8b   : >> { %v464_v16 = vsel %vm451_vm0, %v462_v14, 0.0  ;;  %v467_v17 = vsel %vm451_vm0, %v463_v15, 0.0 }
  0x8c   : >> { %465 = vadd.xlane.f32.xlu0 %v464_v16 }
  0x90   : >> { %468 = vadd.xlane.f32.xlu0 %v467_v17 }
 0x115   : >> { %v466_v18 = vpop.xlane.xlu0 %465 }
 0x119   : >> { %v469_v19 = vpop.xlane.xlu0 %468 }
 0x11a   : >> { %v470_v20 = vmax.f32 %v466_v18, %v469_v19 }
 0x11c   : >> { %v471_v21 = vrot.slane %v470_v20, 4 }
 0x11e   : >> { %v472_v22 = vmax.f32 %v470_v20, %v471_v21 }
 0x120   : >> { %v473_v23 = vrot.slane %v472_v22, 2 }
 0x122   : >> { %v474_v24 = vmax.f32 %v472_v22, %v473_v23 }
 0x124   : >> { %v475_v25 = vrot.slane %v474_v24, 1 }
 0x126   : >> { %v476_v26 = vmax.f32 %v474_v24, %v475_v25 }
 0x128   : >> { %v477_v27 = vsub.f32 %v466_v18, %v476_v26  ;;  %v478_v28 = vsub.f32 %v469_v19, %v476_v26 }
 0x12a   : >> { %v479_v29 = vmul.f32 1.442695, %v477_v27  ;;  %v481_v30 = vmul.f32 1.442695, %v478_v28 }
 0x12c   : >> { %1257 = vpow2.f32 %v479_v29 }
 0x12d   : >> { %1259 = vpow2.f32 %v481_v30 }
 0x139   : >> { %v1258_v31 = vpop.eup %1257 }
 0x13a   : >> { %v1260_v32 = vpop.eup %1259 }
 0x13b   : >> { %v483_v33 = vadd.f32 %v1260_v32, %v1258_v31 }
 0x13d   : >> { %v484_v34 = vrot.slane %v483_v33, 4 }
 0x13f   : >> { %v485_v35 = vadd.f32 %v484_v34, %v483_v33 }
 0x141   : >> { %v486_v36 = vrot.slane %v485_v35, 2 }
 0x143   : >> { %v487_v37 = vadd.f32 %v486_v36, %v485_v35 }
 0x145   : >> { %v488_v38 = vrot.slane %v487_v37, 1 }
 0x147   : >> { %v489_v39 = vadd.f32 %v488_v38, %v487_v37 }
 0x149   : >> { %1261 = vrcp.f32 %v489_v39 }
 0x156   : >> { %v1262_v40 = vpop.eup %1261 }
 0x157   : >> { %v491_v43 = vmul.f32 %v1262_v40, %v1258_v31  ;;  %v492_v44 = vmul.f32 %v1262_v40, %v1260_v32 }
 0x159   : >> { %v493_v47 = vmul.f32 %v491_v43, %v449_v41  ;;  %v494_v48 = vmul.f32 %v492_v44, %v450_v42 }
 0x15b   : >> { %506 = vxpose.xlu1.b32.start [1/2] (short) (narrow) %v493_v47, 64  ;;  %v496_v49 = vsel %vm495_vm1, %v493_v47, 0.0  ;;  %v497_v50 = vsel %vm495_vm1, %v494_v48, 0.0 }
 0x15c   : >> { %v498_v51 = vadd.f32 %v497_v50, %v496_v49 }
 0x15e   : >> { %v499_v52 = vrot.slane %v498_v51, 4 }
 0x15f   : >> { %507 = vxpose.xlu1.b32.end [2/2] (short) (narrow) %v494_v48, 64 }
 0x160   : >> { %v500_v53 = vadd.f32 %v499_v52, %v498_v51 }
 0x162   : >> { %v501_v54 = vrot.slane %v500_v53, 2 }
 0x164   : >> { %v502_v55 = vadd.f32 %v501_v54, %v500_v53 }
 0x166   : >> { %v503_v56 = vrot.slane %v502_v55, 1 }
 0x168   : >> { %v504_v57 = vadd.f32 %v503_v56, %v502_v55 }
 0x16a   : >> { %v505_v58 = vadd.f32 1e-06, %v504_v57 }
 0x16c   : >> { %674 = vst.msk [vmem:[%s672_s25] sm:$0x1] %vm673_vm2, %v505_v58 }
 0x1d7   : >> { %v522_v59 = vpop.trf.xlu1 }
 0x1d8   : >> { %1119 = vmatprep.mubr.msk.f32.mxu0 %vm538_vm3, %v522_v59 }
 0x1db   : >> { %v523_v60 = vpop.trf.xlu1 }
 0x1dc   : >> { %1120 = vmatmul.mubr.msk.f32.vlgmr.msra.gmra.mxu0 %vm538_vm3, %v523_v60 }
 0x1df   : >> { %v524_v61 = vpop.trf.xlu1 }
 0x1e0   : >> { %1122 = vmatprep.mubr.msk.f32.mxu0 %vm538_vm3, %v524_v61 }
 0x1e3   : >> { %v525_v62 = vpop.trf.xlu1 }
 0x1e4   : >> { %1123 = vmatmul.mubr.msk.f32.gmra.mxu0 %vm538_vm3, %v525_v62 }
 0x1e7   : >> { %v526_v63 = vpop.trf.xlu1 }
 0x1e8   : >> { %1125 = vmatprep.mubr.msk.f32.mxu1 %vm538_vm3, %v526_v63 }
 0x1eb   : >> { %v527_v0 = vpop.trf.xlu1 }
 0x1ec   : >> { %1126 = vmatmul.mubr.msk.f32.vlgmr.msra.gmra.mxu1 %vm538_vm3, %v527_v0 }
 0x1ef   : >> { %v528_v1 = vpop.trf.xlu1 }
 0x1f0   : >> { %1128 = vmatprep.mubr.msk.f32.mxu1 %vm538_vm3, %v528_v1 }
 0x1f3   : >> { %v529_v2 = vpop.trf.xlu1 }
 0x1f4   : >> { %1129 = vmatmul.mubr.msk.f32.gmra.mxu1 %vm538_vm3, %v529_v2 }
 0x29c   : >> { %v1121_v3 = vpop.f32.mrf.mxu0 }
 0x29d   : >> { %678 = vst.msk [vmem:[%s676_s17 + $0x8] sm:$0xff] %vm451_vm0, %v1121_v3 }
 0x29e   : >> { %v629_v4 = vpop.f32.mrf.mxu0 }
 0x29f   : >> { %677 = vst.msk [vmem:[%s676_s17] sm:$0xff] %vm451_vm0, %v629_v4 }
 0x2a4   : >> { %v1124_v5 = vpop.f32.mrf.mxu0 }
 0x2a5   : >> { %680 = vst.msk [vmem:[%s676_s17 + $0x18] sm:$0xff] %vm451_vm0, %v1124_v5 }
 0x2a6   : >> { %v639_v6 = vpop.f32.mrf.mxu0 }
 0x2a7   : >> { %679 = vst.msk [vmem:[%s676_s17 + $0x10] sm:$0xff] %vm451_vm0, %v639_v6 }
 0x2ac   : >> { %v1127_v7 = vpop.f32.mrf.mxu1 }
 0x2ad   : >> { %682 = vst.msk [vmem:[%s676_s17 + $0x28] sm:$0xff] %vm451_vm0, %v1127_v7 }
 0x2ae   : >> { %v649_v8 = vpop.f32.mrf.mxu1 }
 0x2af   : >> { %681 = vst.msk [vmem:[%s676_s17 + $0x20] sm:$0xff] %vm451_vm0, %v649_v8 }
 0x2b3   : > { %436 = sbr.rel (!%p434_p8) target bundleno = 117 (0x75), region = 162 }
 0x2b4   : >> { %v1130_v9 = vpop.f32.mrf.mxu1 }
 0x2b5   : >> { %684 = vst.msk [vmem:[%s676_s17 + $0x38] sm:$0xff] %vm451_vm0, %v1130_v9 }
 0x2b6   : >> { %v659_v10 = vpop.f32.mrf.mxu1 }
 0x2b7   : >> { %683 = vst.msk [vmem:[%s676_s17 + $0x30] sm:$0xff] %vm451_vm0, %v659_v10 }
 0x2b8 LB: >> { %s1073_s3 = sshll.u32 %s1511_s22, 6  ;;  %s1072_s5 = sshll.u32 %s1511_s22, 4  ;;  %s1511_s22 = sphi %s1801_s22, %s690_s22  }
 0x2b9   : >> { %s692_s27 = scalar_lea.vmem %s364_s23, %s1072_s5 [#allocation11]  ;;  %s1812_s7 = scalar_lea.vmem [#allocation4], %s1073_s3 }
 0x2ba   : >> { %v693_v14 = vld [vmem:[%s692_s27] sm:$0xff]  ;;  %v694_v15 = vld [vmem:[%s692_s27 + $0x8] sm:$0xff]  ;;  %s787_s28 = scalar_lea.vmem [#allocation3], %s1511_s22  ;;  %s807_s12 = scalar_lea.vmem %s419_s14, %s1072_s5 [#allocation14] }
 0x2bb   : >> { %1147 = vmatprep.mubr.msk.f32.mxu0 %vm495_vm1, %v693_v14  ;;  %v1076_v16 = vld [vmem:[%s787_s28] ss:$0 sm:$0xff]  ;;  %s690_s22 = sadd.s32 1, %s1511_s22  }
 0x2bc   : >> { %v795_v18 = vmul.f32 %v1076_v16, %v693_v14  ;;  %v796_v19 = vmul.f32 %v1076_v16, %v694_v15  ;;  %p687_p0 = scmp.ge.s32.totalorder %s690_s22, 2  }
 0x2bd   : > { %s1094_s13 = sshll.u32 (%p687_p0), %s1495_s21, 9  ;;  %s1930_s24 = sld [smem:[#allocation27_spill]] (%p687_p0) }
 0x2be   : >> { %v704_v11 = vld [vmem:[%s1812_s7 + $0x38] sm:$0xff]  ;;  %v703_v12 = vld [vmem:[%s1812_s7 + $0x30] sm:$0xff]  ;;  %v702_v13 = vld [vmem:[%s1812_s7 + $0x28] sm:$0xff]  ;;  %v797_v21 = vsel %vm495_vm1, %v795_v18, 0.0  ;;  %v800_v23 = vsel %vm495_vm1, %v796_v19, 0.0  ;;  %s828_s16 = sshll.u32 (%p687_p0), %s419_s14, 4  ;;  %s1844_s16 = int_to_ptr.vmem [resolvable:$true] %s828_s16 }
 0x2bf   : >> { %1131 = vmatprep.subr.mxu0 %v704_v11  ;;  %v701_v17 = vld [vmem:[%s1812_s7 + $0x20] sm:$0xff]  ;;  %v700_v20 = vld [vmem:[%s1812_s7 + $0x18] sm:$0xff]  ;;  %798 = vadd.xlane.f32.xlu0 %v797_v21  ;;  %v699_v22 = vld [vmem:[%s1812_s7 + $0x10] sm:$0xff]  ;;  %s812_s30 = scalar_lea.sflag (%p687_p0), [#allocation7], %s1729_s10  ;;  %s1407_s15 = scalar_lea.vmem (%p687_p0), %s1844_s16, 512 }
 0x2c0   : >> { %1132 = vmatpush3.msra.mxu0 %v704_v11  ;;  %v698_v24 = vld [vmem:[%s1812_s7 + $0x8] sm:$0xff]  ;;  %v697_v25 = vld [vmem:[%s1812_s7] sm:$0xff]  ;;  %p1408_p3 = scmp.ne.s32.totalorder (%p687_p0), %s1844_s16, %s1407_s15  ;;  %s1520_s23 = smov (%p687_p0), [#allocation14]  }
 0x2c1   : >> { %1133 = vmatprep.subr.mxu0 %v703_v12  ;;  %s1411_s21 = sshll.u32 (%p687_p0), %s1520_s23, 4  ;;  %s1412_s21 = int_to_ptr.vmem [resolvable:$false] %s1411_s21 }
 0x2c2   : >> { %1134 = vmatpush3.msra.mxu0 %v703_v12  ;;  %p1409_p4 = pnand (%p687_p0), %p1408_p3, %p1608_p9  ;;  %s1413_s8 = scalar_lea.vmem (%p687_p0), %s1412_s21, 1024 }
 0x2c3   : >> { %1135 = vmatprep.subr.mxu0 %v702_v13  ;;  %801 = vadd.xlane.f32.xlu0 %v800_v23  ;;  %s1840_s18 = scalar_lea.hbm (%p687_p0), %s1930_s24, %s1094_s13  ;;  %p1414_p7 = scmp.lt.s32.totalorder (%p687_p0), %s1844_s16, %s1412_s21 }
 0x2c4   : >> { %1136 = vmatpush3.msra.mxu0 %v702_v13  ;;  %p1410_p2 = pneg (%p687_p0), %p1409_p4  ;;  %p1415_p10 = scmp.lt.s32.totalorder (%p687_p0), %s1413_s8, %s1407_s15 }
 0x2c5   : >> { %1137 = vmatprep.subr.mxu0 %v701_v17 }
 0x2c6   : >> { %1138 = vmatpush3.msra.mxu0 %v701_v17  ;;  %p1416_p13 = por (%p687_p0), %p1415_p10, %p1414_p7 }
 0x2c7   : >> { %1139 = vmatprep.subr.mxu0 %v700_v20 }
 0x2c8   : >> { %1140 = vmatpush3.msra.mxu0 %v700_v20  ;;  %p1417_p12 = pnand (%p687_p0), %p1416_p13, %p1410_p2 }
 0x2c9   : >> { %1141 = vmatprep.subr.mxu0 %v699_v22 }
 0x2ca   : >> { %1142 = vmatpush3.msra.mxu0 %v699_v22 }
 0x2cb   : >> { %1143 = vmatprep.subr.mxu0 %v698_v24 }
 0x2cc   : >> { %1144 = vmatpush3.msra.mxu0 %v698_v24 }
 0x2cd   : >> { %1145 = vmatprep.subr.mxu0 %v697_v25 }
 0x2ce   : >> { %1146 = vmatpush3.msra.mxu0 %v697_v25 }
 0x2cf   : >> { %1148 = vmatmul.mubr.msk.f32.vlgmr.msra.gmra.mxu0 %vm495_vm1, %v694_v15 }
 0x348   : >> { %v799_v26 = vpop.xlane.xlu0 %798 }
 0x34c   : >> { %v802_v27 = vpop.xlane.xlu0 %801 }
 0x34d   : >> { %1263 = vrcp.f32 %v802_v27 }
 0x34e   : >> { %1265 = vrcp.f32 %v799_v26 }
 0x35a   : >> { %v1264_v28 = vpop.eup %1263 }
 0x35b   : >> { %v1266_v31 = vpop.eup %1265 }
 0x38f   : >> { %v1149_v29 = vpop.f32.mrf.mxu0 }
 0x390   : >> { %v806_v30 = vmul.f32 %v1264_v28, %v1149_v29  ;;  %689 = sbr.rel (!%p687_p0) target bundleno = 696 (0x2b8), region = 173 }
 0x391   : >> { %v778_v32 = vpop.f32.mrf.mxu0 }
 0x392   : >> { %810 = vst.msk [vmem:[%s807_s12 + $0x8] sm:$0xff] %vm451_vm0, %v806_v30  ;;  %v805_v33 = vmul.f32 %v1266_v31, %v778_v32 }
 0x394   : >> { %809 = vst.msk [vmem:[%s807_s12] sm:$0xff] %vm451_vm0, %v805_v33 }
 0x395   : > { %1420 = shalt.err (!%p1417_p12)
}
 0x396   : > { %s1421_s11 = scalar_lea.hbm %s1840_s18, 512  ;;  %s1425_s25 = scalar_lea.hbm %s1930_s24, 1024 }
 0x397   : > { %p1422_p5 = scmp.ne.s32.totalorder %s1840_s18, %s1421_s11  ;;  %p1426_p8 = scmp.lt.s32.totalorder %s1840_s18, %s1930_s24 }
 0x398   : > { %p1427_p0 = scmp.lt.s32.totalorder %s1425_s25, %s1421_s11 }
 0x399   : > { %p1423_p6 = pnand %p1422_p5, %p1608_p9 }
 0x39a   : > { %p1428_p3 = por %p1427_p0, %p1426_p8 }
 0x39b   : > { %p1424_p1 = pneg %p1423_p6 }
 0x39d   : > { %p1429_p4 = pnand %p1428_p3, %p1424_p1 }
 0x39f   : > { %1432 = shalt.err (!%p1429_p4)
}
 0x3a0   : > { %s1521_s22 = smov 128   ;;  %s1522_s3 = smov 8  }
 0x3a1   : > { %1164 = dma.vmem_to_hbm [thread:$0]  (%p1608_p9), %s1844_s16, 512, %s1840_s18, %s812_s30, %s1521_s22, %s1521_s22, %s1522_s3  }
 0x3a2 PF: > { %s1931_s5 = sld [smem:[#allocation19_spill]] }
 0x3a3   : > { %s1933_s7 = sld [smem:[#allocation21_spill]] }
 0x3a8   : > { %s843_s28 = sand.u32 1, %s1931_s5  }
 0x3a9   : > { %p1934_p2 = scmp.ge.s32.totalorder %s1933_s7, 2  ;;  %s844_s12 = scalar_lea.sflag [#allocation7], %s843_s28 }
 0x3ab   : > { %p1183_p7 = pnand %p1934_p2, %p1615_p11 }
 0x3ad   : > { %p1184_p10 = pneg %p1183_p7 }
 0x3af   : > { %1478 = dma.done.wait (%p1184_p10), %s844_s12, 512  }
 0x3b0   : > { %1480 = vsyncadd (%p1184_p10), %s844_s12, 4294966784  ;;  %s27_s23 = sadd.s32 1, %s1933_s7   ;;  %s1935_s6 = sld [smem:[#allocation23_spill]] }
 0x3b1   : > { %p24_p13 = scmp.ge.s32.totalorder %s27_s23, 4   ;;  %s1936_s21 = sld [smem:[#allocation20_spill]] }
 0x3b2   : > { %s1937_s22 = sld [smem:[#allocation22_spill]]  ;;  %s1938_s18 = smov %s1487_s19 }
 0x3b3   : > { %s1939_s19 = smov %s1491_s20  ;;  %26 = sbr.rel (!%p24_p13) target bundleno = 14 (0xe), region = 184 }
 0x3b6   : > { %s1940_s20 = smov %s1935_s6 }
 0x3b8   :  { %849 = vsyncpa [#allocation6], 1 }
 0x3b9   :  { %851 = vsyncpa [#allocation6 + $0x1], 1 }
 0x3ba   :  { %852 = vsyncpa [#allocation9], 1 }
 0x3bb   :  { %854 = vsyncpa [#allocation9 + $0x1], 1 }
 0x3bc   :  { %855 = vsyncpa [#allocation12], 1 }
 0x3bd   :  { %857 = vsyncpa [#allocation12 + $0x1], 1 }
 0x3be   :  { %858 = vsyncpa [#allocation7], 1 }
 0x3bf   :  { %860 = vsyncpa [#allocation7 + $0x1], 1 }

</bundles_post_ra>
